<compile_context>
chip_gen: v5e
topology: v5e:2x2
jax: 0.10.0
libtpu: 0.0.40
codegen_flags: <defaults>
</compile_context>

<pallas_src>
import functools
import math
from typing import NamedTuple

import jax
import jax.numpy as jnp
from jax.experimental import pallas as pl
from jax.experimental.pallas import tpu as pltpu


# ----------------------------------------------------------------------------- helpers
def _round_up(x: int, m: int) -> int:
    return (x + m - 1) // m * m


def _cdiv(a: int, b: int) -> int:
    return (a + b - 1) // b


def _probe_buffered() -> bool:
    """True if BlockSpec supports pipeline_mode=pl.Buffered(1) (single weight buffer)."""
    if not hasattr(pl, "Buffered"):
        return False
    try:
        pl.BlockSpec((8, 128), lambda i: (0, 0), pipeline_mode=pl.Buffered(1))
        return True
    except TypeError:
        return False


_BUFFERED_OK = _probe_buffered()


def _num_tensorcores() -> int:
    """Heuristic TensorCores per chip (v4 megacore / v5p / v7x => 2, else 1)."""
    try:
        kind = jax.devices()[0].device_kind.lower()
    except Exception:
        return 1
    if "v5p" in kind or "v7" in kind or ("v4" in kind and "v4i" not in kind):
        return 2
    return 1


def _vmem_capacity_bytes() -> int:
    try:
        info = pltpu.get_tpu_info()
        cap = int(getattr(info, "vmem_capacity_bytes", 0))
        if cap > 0:
            return cap
    except Exception:
        pass
    return 128 * 1024 * 1024


def _invariant_spec(shape, index_map):
    """Grid-invariant (weight/bias) block; single pipeline buffer when supported."""
    if _BUFFERED_OK:
        return pl.BlockSpec(shape, index_map, pipeline_mode=pl.Buffered(1))
    return pl.BlockSpec(shape, index_map)


def _vmem_needed(tile: int, dim_p: int, dh_p: int, act_itemsize: int,
                 w_itemsize: int) -> int:
    """Estimate of VMEM working set for one pipelined row tile."""
    w_buffers = 1 if _BUFFERED_OK else 2            # Buffered(1) => single weight copy
    weight_bytes = w_buffers * 2 * dim_p * dh_p * w_itemsize
    bias_bytes = w_buffers * (dim_p + dh_p) * 4
    tile_io_bytes = 2 * 2 * tile * (dim_p + dh_p) * act_itemsize  # x+h, in+out, 2-deep
    work_bytes = tile * (dim_p + dh_p) * 4 + tile * max(dim_p, dh_p) * 4  # f32 x,h + gate
    return weight_bytes + bias_bytes + tile_io_bytes + work_bytes


def _pick_tile(n_rows: int, row_tile: int, other_steps: int, num_tc: int) -> int:
    tile = max(8, min(_round_up(row_tile, 8), _round_up(n_rows, 8)))
    if num_tc > 1:
        # >= 2 pipelined grid steps per TensorCore on multi-TC chips; no split on 1-TC.
        want = 2 * num_tc
        while other_steps * _cdiv(n_rows, tile) < want and tile > 8:
            tile = max(8, _round_up(tile // 2, 8))
    return tile


# ----------------------------------------------------------------------------- params
class MogrifierParams(NamedTuple):
    wq_t: jax.Array      # (dh_p, dim_p)  0.5 * Wq^T, zero-padded, matmul dtype
    bq_row: jax.Array    # (1, dim_p)     0.5 * bq, f32
    wr_t: jax.Array      # (dim_p, dh_p)  0.5 * Wr^T, zero-padded, matmul dtype
    br_row: jax.Array    # (1, dh_p)      0.5 * br, f32
    dim: int
    dim_hidden: int
    dim_p: int
    dh_p: int


def prepare_mogrifier_params(wq, bq, wr, br, *, matmul_dtype=None) -> MogrifierParams:
    """One-time parameter prep (hoisted out of the forward call).

    wq: (dim, dim_hidden)  [PyTorch Linear(dim_hidden, dim).weight]
    bq: (dim,)
    wr: (dim_hidden, dim)  [PyTorch Linear(dim, dim_hidden).weight]
    br: (dim_hidden,)

    matmul_dtype: dtype of the MXU operands. Default bf16 (f32 accumulation) per the
    perf review — pass jnp.float32 for exact module precision.
    The 0.5 prescale implements 2*sigmoid(z) == 1 + tanh(z/2) so the kernel only
    needs one tanh per gate.
    """
    dim, dim_hidden = int(wq.shape[0]), int(wq.shape[1])
    assert wr.shape == (dim_hidden, dim)
    assert bq.shape == (dim,)
    assert br.shape == (dim_hidden,)
    if matmul_dtype is None:
        matmul_dtype = jnp.bfloat16
    matmul_dtype = jnp.dtype(matmul_dtype)

    dim_p = _round_up(dim, 128)
    dh_p = _round_up(dim_hidden, 128)

    wq_t = (0.5 * wq.astype(jnp.float32)).T.astype(matmul_dtype)       # (dh, dim)
    wr_t = (0.5 * wr.astype(jnp.float32)).T.astype(matmul_dtype)       # (dim, dh)
    bq_row = (0.5 * bq.astype(jnp.float32)).reshape(1, dim)
    br_row = (0.5 * br.astype(jnp.float32)).reshape(1, dim_hidden)

    if dim_p != dim or dh_p != dim_hidden:
        wq_t = jnp.pad(wq_t, ((0, dh_p - dim_hidden), (0, dim_p - dim)))
        wr_t = jnp.pad(wr_t, ((0, dim_p - dim), (0, dh_p - dim_hidden)))
        bq_row = jnp.pad(bq_row, ((0, 0), (0, dim_p - dim)))
        br_row = jnp.pad(br_row, ((0, 0), (0, dh_p - dim_hidden)))

    return MogrifierParams(wq_t, bq_row, wr_t, br_row, dim, dim_hidden, dim_p, dh_p)


# ----------------------------------------------------------------------------- kernel
def _mogrifier_kernel(x_ref, h_ref, wq_ref, bq_ref, wr_ref, br_ref,
                      x_out_ref, h_out_ref, *, iters: int):
    x = x_ref[...].astype(jnp.float32)             # (tm, dim_p)
    h = h_ref[...].astype(jnp.float32)             # (tm, dh_p) or (1, dh_p)
    if h.shape[0] != x.shape[0]:
        # (b, d) hiddens path: one hidden row per batch, broadcast once over the tile.
        h = jnp.broadcast_to(h, (x.shape[0],) + h.shape[1:])

    wq = wq_ref[...]                                # (dh_p, dim_p) resident, matmul dtype
    wr = wr_ref[...]                                # (dim_p, dh_p)
    bq = bq_ref[...].astype(jnp.float32)            # (1, dim_p)
    br = br_ref[...].astype(jnp.float32)            # (1, dh_p)
    mm_dtype = wq.dtype

    # Small static unrolled loop, matches `for ind in range(iters)`.
    # Weights/biases are prescaled by 0.5, so 1 + tanh(z) == 2 * sigmoid(h @ W^T + b).
    for ind in range(iters):
        if ind % 2 == 0:
            z = jnp.dot(h.astype(mm_dtype), wq,
                        preferred_element_type=jnp.float32) + bq
            x = (1.0 + jnp.tanh(z)) * x
        else:
            z = jnp.dot(x.astype(mm_dtype), wr,
                        preferred_element_type=jnp.float32) + br
            h = (1.0 + jnp.tanh(z)) * h

    x_out_ref[...] = x.astype(x_out_ref.dtype)
    h_out_ref[...] = h.astype(h_out_ref.dtype)


# ----------------------------------------------------------------------------- wrapper
def mogrifier_pallas_prepared(inputs, hiddens, params: MogrifierParams, *,
                              iters: int = 5, row_tile=None):
    wq_t, bq_row, wr_t, br_row, dim, dim_hidden, dim_p, dh_p = params
    assert inputs.shape[-1] == dim
    assert hiddens.shape[-1] == dim_hidden

    num_tc = _num_tensorcores()
    vmem_cap = _vmem_capacity_bytes()
    ceiling = max(32 * 1024 * 1024, (vmem_cap * 3) // 4)   # headroom for Mosaic scratch
    if row_tile is None:
        # 512-row tiles on 128-MiB VMEM chips (v5e/v6e), 256 on v7x (64 MiB).
        row_tile = 512 if vmem_cap >= (96 << 20) else 256

    act_itemsize = max(jnp.dtype(inputs.dtype).itemsize,
                       jnp.dtype(hiddens.dtype).itemsize)
    w_itemsize = jnp.dtype(wq_t.dtype).itemsize

    broadcast_hiddens = (inputs.ndim == 3 and hiddens.ndim == 2)
    if broadcast_hiddens:
        assert inputs.shape[0] == hiddens.shape[0]
        batch, seq = int(inputs.shape[0]), int(inputs.shape[1])
        n_rows, other = seq, batch
    else:
        assert inputs.shape[:-1] == hiddens.shape[:-1]
        lead = inputs.shape[:-1]
        n_rows, other = int(math.prod(lead)), 1

    tm = _pick_tile(n_rows, int(row_tile), other, num_tc)
    # Shrink the row tile if the working set would overflow the per-chip VMEM budget.
    while tm > 8 and _vmem_needed(tm, dim_p, dh_p, act_itemsize, w_itemsize) > (ceiling * 9) // 10:
        tm = max(8, _round_up(tm // 2, 8))
    needed = _vmem_needed(tm, dim_p, dh_p, act_itemsize, w_itemsize)
    vmem_limit = int(min(max((needed * 3) // 2, 32 * 1024 * 1024), ceiling))

    kernel = functools.partial(_mogrifier_kernel, iters=iters)

    if broadcast_hiddens:
        # (batch, seq-tile) grid; hiddens stay (B, 1, dh) — no HBM-side repeat.
        x3 = inputs
        h3 = hiddens.reshape(batch, 1, dim_hidden)
        if dim_p != dim:
            x3 = jnp.pad(x3, ((0, 0), (0, 0), (0, dim_p - dim)))
        if dh_p != dim_hidden:
            h3 = jnp.pad(h3, ((0, 0), (0, 0), (0, dh_p - dim_hidden)))
        grid = (batch, _cdiv(seq, tm))
        in_specs = [
            pl.BlockSpec((None, tm, dim_p), lambda b, s: (b, s, 0)),
            pl.BlockSpec((None, 1, dh_p), lambda b, s: (b, 0, 0)),
            _invariant_spec((dh_p, dim_p), lambda b, s: (0, 0)),
            _invariant_spec((1, dim_p), lambda b, s: (0, 0)),
            _invariant_spec((dim_p, dh_p), lambda b, s: (0, 0)),
            _invariant_spec((1, dh_p), lambda b, s: (0, 0)),
        ]
        out_specs = [
            pl.BlockSpec((None, tm, dim_p), lambda b, s: (b, s, 0)),
            pl.BlockSpec((None, tm, dh_p), lambda b, s: (b, s, 0)),
        ]
        out_shape = (jax.ShapeDtypeStruct((batch, seq, dim_p), inputs.dtype),
                     jax.ShapeDtypeStruct((batch, seq, dh_p), hiddens.dtype))
        dim_sem = ("parallel", "parallel")
        operands = (x3, h3)
    else:
        # Flat row grid over packed (N, d) activations; no row padding (cdiv + masked tail).
        x2 = inputs.reshape(n_rows, dim)
        h2 = hiddens.reshape(n_rows, dim_hidden)
        if dim_p != dim:
            x2 = jnp.pad(x2, ((0, 0), (0, dim_p - dim)))
        if dh_p != dim_hidden:
            h2 = jnp.pad(h2, ((0, 0), (0, dh_p - dim_hidden)))
        grid = (_cdiv(n_rows, tm),)
        in_specs = [
            pl.BlockSpec((tm, dim_p), lambda i: (i, 0)),
            pl.BlockSpec((tm, dh_p), lambda i: (i, 0)),
            _invariant_spec((dh_p, dim_p), lambda i: (0, 0)),
            _invariant_spec((1, dim_p), lambda i: (0, 0)),
            _invariant_spec((dim_p, dh_p), lambda i: (0, 0)),
            _invariant_spec((1, dh_p), lambda i: (0, 0)),
        ]
        out_specs = [
            pl.BlockSpec((tm, dim_p), lambda i: (i, 0)),
            pl.BlockSpec((tm, dh_p), lambda i: (i, 0)),
        ]
        out_shape = (jax.ShapeDtypeStruct((n_rows, dim_p), inputs.dtype),
                     jax.ShapeDtypeStruct((n_rows, dh_p), hiddens.dtype))
        dim_sem = ("parallel",)
        operands = (x2, h2)

    x_out, h_out = pl.pallas_call(
        kernel,
        out_shape=out_shape,
        grid_spec=pltpu.PrefetchScalarGridSpec(
            num_scalar_prefetch=0,
            grid=grid,
            in_specs=in_specs,
            out_specs=out_specs,
        ),
        compiler_params=pltpu.CompilerParams(
            dimension_semantics=dim_sem,
            vmem_limit_bytes=vmem_limit),
    )(*operands, wq_t, bq_row, wr_t, br_row)

    if broadcast_hiddens:
        x_out = x_out[..., :dim]
        h_out = h_out[..., :dim_hidden]
    else:
        x_out = x_out[:, :dim].reshape(lead + (dim,))
        h_out = h_out[:, :dim_hidden].reshape(lead + (dim_hidden,))
    return x_out, h_out


def mogrifier_pallas(inputs, hiddens, wq, bq, wr, br, *, iters=5, row_tile=None,
                     matmul_dtype=None):
    """Convenience wrapper: prep params (transpose + 0.5-prescale + pad) then run."""
    params = prepare_mogrifier_params(wq, bq, wr, br, matmul_dtype=matmul_dtype)
    return mogrifier_pallas_prepared(inputs, hiddens, params, iters=iters,
                                     row_tile=row_tile)


# ----------------------------------------------------------------------------- reference
def mogrifier_ref(inputs, hiddens, wq, bq, wr, br, *, iters=5, matmul_dtype=None):
    """Pure-JAX mirror of the PyTorch forward.

    matmul_dtype=None keeps f32 operands (module semantics); matmul_dtype=jnp.bfloat16
    mirrors the kernel's default bf16 MXU operands (f32 accumulation).
    """
    if inputs.ndim == 3 and hiddens.ndim == 2:
        hiddens = jnp.broadcast_to(hiddens[:, None, :],
                                   inputs.shape[:-1] + (hiddens.shape[-1],))
    cast = (lambda a: a) if matmul_dtype is None else (lambda a: a.astype(matmul_dtype))
    x = inputs.astype(jnp.float32)
    h = hiddens.astype(jnp.float32)
    wq_f, wr_f = wq.astype(jnp.float32), wr.astype(jnp.float32)
    bq_f, br_f = bq.astype(jnp.float32), br.astype(jnp.float32)
    for ind in range(iters):
        if ind % 2 == 0:
            z = jnp.dot(cast(h), cast(wq_f.T), preferred_element_type=jnp.float32) + bq_f
            x = 2.0 * jax.nn.sigmoid(z) * x
        else:
            z = jnp.dot(cast(x), cast(wr_f.T), preferred_element_type=jnp.float32) + br_f
            h = 2.0 * jax.nn.sigmoid(z) * h
    return x.astype(inputs.dtype), h.astype(hiddens.dtype)


# ----------------------------------------------------------------------------- test
if __name__ == "__main__":
    batch, seq, dim, dim_hidden, iters = 2, 8, 32, 32, 5

    key = jax.random.PRNGKey(0)
    k_x, k_h, k_h2, k_wq, k_bq, k_wr, k_br = jax.random.split(key, 7)

    inputs = jax.random.normal(k_x, (batch, seq, dim), dtype=jnp.float32)
    hiddens = jax.random.normal(k_h, (batch, seq, dim_hidden), dtype=jnp.float32)

    # Deterministic nn.Linear-style init: U(-1/sqrt(fan_in), 1/sqrt(fan_in)).
    bound_q = 1.0 / (dim_hidden ** 0.5)
    bound_r = 1.0 / (dim ** 0.5)
    wq = jax.random.uniform(k_wq, (dim, dim_hidden), jnp.float32, -bound_q, bound_q)
    bq = jax.random.uniform(k_bq, (dim,), jnp.float32, -bound_q, bound_q)
    wr = jax.random.uniform(k_wr, (dim_hidden, dim), jnp.float32, -bound_r, bound_r)
    br = jax.random.uniform(k_br, (dim_hidden,), jnp.float32, -bound_r, bound_r)

    # Hoisted parameter prep (done once per layer, not per call). Default = bf16 MXU
    # operands with f32 accumulation.
    params = prepare_mogrifier_params(wq, bq, wr, br)

    # --- path A: hiddens with the same leading shape as inputs ---
    x_out, h_out = mogrifier_pallas_prepared(inputs, hiddens, params, iters=iters)
    x_out = jax.block_until_ready(x_out)
    h_out = jax.block_until_ready(h_out)
    assert x_out.shape == (batch, seq, dim)
    assert h_out.shape == (batch, seq, dim_hidden)

    # Tight check against a reference that uses the same bf16 matmul operands.
    x_rb, h_rb = mogrifier_ref(inputs, hiddens, wq, bq, wr, br, iters=iters,
                               matmul_dtype=jnp.bfloat16)
    assert jnp.allclose(x_out, x_rb, atol=5e-3, rtol=5e-3)
    assert jnp.allclose(h_out, h_rb, atol=5e-3, rtol=5e-3)

    # Loose check against the full-f32 module semantics (documents the bf16-operand
    # rounding delta of the default fast path).
    x_rf, h_rf = mogrifier_ref(inputs, hiddens, wq, bq, wr, br, iters=iters)
    assert jnp.allclose(x_out, x_rf, atol=1e-1, rtol=1e-1)
    assert jnp.allclose(h_out, h_rf, atol=1e-1, rtol=1e-1)

    # --- path B: (batch, dim_hidden) hiddens broadcast over the sequence, no HBM repeat ---
    hid2 = jax.random.normal(k_h2, (batch, dim_hidden), dtype=jnp.float32)
    x_out2, h_out2 = mogrifier_pallas_prepared(inputs, hid2, params, iters=iters)
    x_out2 = jax.block_until_ready(x_out2)
    h_out2 = jax.block_until_ready(h_out2)
    assert x_out2.shape == (batch, seq, dim)
    assert h_out2.shape == (batch, seq, dim_hidden)
    x_rb2, h_rb2 = mogrifier_ref(inputs, hid2, wq, bq, wr, br, iters=iters,
                                 matmul_dtype=jnp.bfloat16)
    assert jnp.allclose(x_out2, x_rb2, atol=5e-3, rtol=5e-3)
    assert jnp.allclose(h_out2, h_rb2, atol=5e-3, rtol=5e-3)

    # --- exact (f32-operand) matmul path, for callers that need module-exact precision ---
    params_f32 = prepare_mogrifier_params(wq, bq, wr, br, matmul_dtype=jnp.float32)
    x_out3, h_out3 = mogrifier_pallas_prepared(inputs, hiddens, params_f32, iters=iters)
    x_out3 = jax.block_until_ready(x_out3)
    h_out3 = jax.block_until_ready(h_out3)
    assert jnp.allclose(x_out3, x_rf, atol=1e-1, rtol=1e-1)
    assert jnp.allclose(h_out3, h_rf, atol=1e-1, rtol=1e-1)

    print("KERNEL_OK")
</pallas_src>

<mosaic_0001>
module attributes {stable_mosaic.version = 11 : i64} {
  func.func @_mogrifier_kernel(%arg0: i32, %arg1: memref<16x128xf32, #tpu.memory_space<vmem>>, %arg2: memref<16x128xf32, #tpu.memory_space<vmem>>, %arg3: memref<128x128xbf16, #tpu.memory_space<vmem>>, %arg4: memref<1x128xf32, #tpu.memory_space<vmem>>, %arg5: memref<128x128xbf16, #tpu.memory_space<vmem>>, %arg6: memref<1x128xf32, #tpu.memory_space<vmem>>, %arg7: memref<16x128xf32, #tpu.memory_space<vmem>>, %arg8: memref<16x128xf32, #tpu.memory_space<vmem>>) attributes {dimension_semantics = [#tpu.dimension_semantics<parallel>], iteration_bounds = array<i64: 1>, scalar_prefetch = 0 : i64, scratch_operands = 0 : i64, tpu.core_type = #tpu.core_type<tc>, window_params = [{transform_indices = @transform_0, window_bounds = array<i64: 16, 128>}, {transform_indices = @transform_1, window_bounds = array<i64: 16, 128>}, {pipeline_mode = #tpu.pipeline_mode<synchronous>, transform_indices = @transform_2, window_bounds = array<i64: 128, 128>}, {pipeline_mode = #tpu.pipeline_mode<synchronous>, transform_indices = @transform_3, window_bounds = array<i64: 1, 128>}, {pipeline_mode = #tpu.pipeline_mode<synchronous>, transform_indices = @transform_4, window_bounds = array<i64: 128, 128>}, {pipeline_mode = #tpu.pipeline_mode<synchronous>, transform_indices = @transform_5, window_bounds = array<i64: 1, 128>}, {transform_indices = @transform_6, window_bounds = array<i64: 16, 128>}, {transform_indices = @transform_7, window_bounds = array<i64: 16, 128>}]} {
    %c0 = arith.constant 0 : index
    %c0_0 = arith.constant 0 : index
    %0 = vector.load %arg1[%c0, %c0_0] : memref<16x128xf32, #tpu.memory_space<vmem>>, vector<16x128xf32>
    %c0_1 = arith.constant 0 : index
    %c0_2 = arith.constant 0 : index
    %1 = vector.load %arg2[%c0_1, %c0_2] : memref<16x128xf32, #tpu.memory_space<vmem>>, vector<16x128xf32>
    %c0_3 = arith.constant 0 : index
    %c0_4 = arith.constant 0 : index
    %2 = vector.load %arg3[%c0_3, %c0_4] : memref<128x128xbf16, #tpu.memory_space<vmem>>, vector<128x128xbf16>
    %c0_5 = arith.constant 0 : index
    %c0_6 = arith.constant 0 : index
    %3 = vector.load %arg5[%c0_5, %c0_6] : memref<128x128xbf16, #tpu.memory_space<vmem>>, vector<128x128xbf16>
    %c0_7 = arith.constant 0 : index
    %c0_8 = arith.constant 0 : index
    %4 = vector.load %arg4[%c0_7, %c0_8] : memref<1x128xf32, #tpu.memory_space<vmem>>, vector<1x128xf32>
    %c0_9 = arith.constant 0 : index
    %c0_10 = arith.constant 0 : index
    %5 = vector.load %arg6[%c0_9, %c0_10] : memref<1x128xf32, #tpu.memory_space<vmem>>, vector<1x128xf32>
    %6 = arith.truncf %1 : vector<16x128xf32> to vector<16x128xbf16>
    %cst = arith.constant dense<0.000000e+00> : vector<16x128xf32>
    %7 = tpu.matmul %6, %2, %cst {dimension_numbers = #tpu.dot_dimension_numbers<[1], [0], [0], [1], [0, 0, 1, 1], [], []>} : vector<16x128xbf16>, vector<128x128xbf16>, vector<16x128xf32> -> vector<16x128xf32>
    %8 = vector.broadcast %4 : vector<1x128xf32> to vector<16x128xf32>
    %9 = arith.addf %7, %8 : vector<16x128xf32>
    %10 = math.tanh %9 : vector<16x128xf32>
    %cst_11 = arith.constant 1.000000e+00 : f32
    %11 = vector.broadcast %cst_11 : f32 to vector<16x128xf32>
    %12 = arith.addf %11, %10 : vector<16x128xf32>
    %13 = arith.mulf %12, %0 : vector<16x128xf32>
    %14 = arith.truncf %13 : vector<16x128xf32> to vector<16x128xbf16>
    %cst_12 = arith.constant dense<0.000000e+00> : vector<16x128xf32>
    %15 = tpu.matmul %14, %3, %cst_12 {dimension_numbers = #tpu.dot_dimension_numbers<[1], [0], [0], [1], [0, 0, 1, 1], [], []>} : vector<16x128xbf16>, vector<128x128xbf16>, vector<16x128xf32> -> vector<16x128xf32>
    %16 = vector.broadcast %5 : vector<1x128xf32> to vector<16x128xf32>
    %17 = arith.addf %15, %16 : vector<16x128xf32>
    %18 = math.tanh %17 : vector<16x128xf32>
    %cst_13 = arith.constant 1.000000e+00 : f32
    %19 = vector.broadcast %cst_13 : f32 to vector<16x128xf32>
    %20 = arith.addf %19, %18 : vector<16x128xf32>
    %21 = arith.mulf %20, %1 : vector<16x128xf32>
    %22 = arith.truncf %21 : vector<16x128xf32> to vector<16x128xbf16>
    %cst_14 = arith.constant dense<0.000000e+00> : vector<16x128xf32>
    %23 = tpu.matmul %22, %2, %cst_14 {dimension_numbers = #tpu.dot_dimension_numbers<[1], [0], [0], [1], [0, 0, 1, 1], [], []>} : vector<16x128xbf16>, vector<128x128xbf16>, vector<16x128xf32> -> vector<16x128xf32>
    %24 = vector.broadcast %4 : vector<1x128xf32> to vector<16x128xf32>
    %25 = arith.addf %23, %24 : vector<16x128xf32>
    %26 = math.tanh %25 : vector<16x128xf32>
    %cst_15 = arith.constant 1.000000e+00 : f32
    %27 = vector.broadcast %cst_15 : f32 to vector<16x128xf32>
    %28 = arith.addf %27, %26 : vector<16x128xf32>
    %29 = arith.mulf %28, %13 : vector<16x128xf32>
    %30 = arith.truncf %29 : vector<16x128xf32> to vector<16x128xbf16>
    %cst_16 = arith.constant dense<0.000000e+00> : vector<16x128xf32>
    %31 = tpu.matmul %30, %3, %cst_16 {dimension_numbers = #tpu.dot_dimension_numbers<[1], [0], [0], [1], [0, 0, 1, 1], [], []>} : vector<16x128xbf16>, vector<128x128xbf16>, vector<16x128xf32> -> vector<16x128xf32>
    %32 = vector.broadcast %5 : vector<1x128xf32> to vector<16x128xf32>
    %33 = arith.addf %31, %32 : vector<16x128xf32>
    %34 = math.tanh %33 : vector<16x128xf32>
    %cst_17 = arith.constant 1.000000e+00 : f32
    %35 = vector.broadcast %cst_17 : f32 to vector<16x128xf32>
    %36 = arith.addf %35, %34 : vector<16x128xf32>
    %37 = arith.mulf %36, %21 : vector<16x128xf32>
    %38 = arith.truncf %37 : vector<16x128xf32> to vector<16x128xbf16>
    %cst_18 = arith.constant dense<0.000000e+00> : vector<16x128xf32>
    %39 = tpu.matmul %38, %2, %cst_18 {dimension_numbers = #tpu.dot_dimension_numbers<[1], [0], [0], [1], [0, 0, 1, 1], [], []>} : vector<16x128xbf16>, vector<128x128xbf16>, vector<16x128xf32> -> vector<16x128xf32>
    %40 = vector.broadcast %4 : vector<1x128xf32> to vector<16x128xf32>
    %41 = arith.addf %39, %40 : vector<16x128xf32>
    %42 = math.tanh %41 : vector<16x128xf32>
    %cst_19 = arith.constant 1.000000e+00 : f32
    %43 = vector.broadcast %cst_19 : f32 to vector<16x128xf32>
    %44 = arith.addf %43, %42 : vector<16x128xf32>
    %45 = arith.mulf %44, %29 : vector<16x128xf32>
    %c0_20 = arith.constant 0 : index
    %c0_21 = arith.constant 0 : index
    %46 = vector.load %arg7[%c0_20, %c0_21] : memref<16x128xf32, #tpu.memory_space<vmem>>, vector<16x128xf32>
    tpu.vector_store %arg7[%c0_20, %c0_21], %45 {strides = array<i32>} : memref<16x128xf32, #tpu.memory_space<vmem>>, vector<16x128xf32>,
    %c0_22 = arith.constant 0 : index
    %c0_23 = arith.constant 0 : index
    %47 = vector.load %arg8[%c0_22, %c0_23] : memref<16x128xf32, #tpu.memory_space<vmem>>, vector<16x128xf32>
    tpu.vector_store %arg8[%c0_22, %c0_23], %37 {strides = array<i32>} : memref<16x128xf32, #tpu.memory_space<vmem>>, vector<16x128xf32>,
    return
  }
  func.func @transform_0(%arg0: i32) -> (i32, i32) {
    %c0_i32 = arith.constant 0 : i32
    %c0_i32_0 = arith.constant 0 : i32
    return %arg0, %c0_i32 : i32, i32
  }
  func.func @transform_1(%arg0: i32) -> (i32, i32) {
    %c0_i32 = arith.constant 0 : i32
    %c0_i32_0 = arith.constant 0 : i32
    return %arg0, %c0_i32 : i32, i32
  }
  func.func @transform_2(%arg0: i32) -> (i32, i32) {
    %c0_i32 = arith.constant 0 : i32
    %c0_i32_0 = arith.constant 0 : i32
    %c0_i32_1 = arith.constant 0 : i32
    return %c0_i32, %c0_i32_0 : i32, i32
  }
  func.func @transform_3(%arg0: i32) -> (i32, i32) {
    %c0_i32 = arith.constant 0 : i32
    %c0_i32_0 = arith.constant 0 : i32
    %c0_i32_1 = arith.constant 0 : i32
    return %c0_i32, %c0_i32_0 : i32, i32
  }
  func.func @transform_4(%arg0: i32) -> (i32, i32) {
    %c0_i32 = arith.constant 0 : i32
    %c0_i32_0 = arith.constant 0 : i32
    %c0_i32_1 = arith.constant 0 : i32
    return %c0_i32, %c0_i32_0 : i32, i32
  }
  func.func @transform_5(%arg0: i32) -> (i32, i32) {
    %c0_i32 = arith.constant 0 : i32
    %c0_i32_0 = arith.constant 0 : i32
    %c0_i32_1 = arith.constant 0 : i32
    return %c0_i32, %c0_i32_0 : i32, i32
  }
  func.func @transform_6(%arg0: i32) -> (i32, i32) {
    %c0_i32 = arith.constant 0 : i32
    %c0_i32_0 = arith.constant 0 : i32
    return %arg0, %c0_i32 : i32, i32
  }
  func.func @transform_7(%arg0: i32) -> (i32, i32) {
    %c0_i32 = arith.constant 0 : i32
    %c0_i32_0 = arith.constant 0 : i32
    return %arg0, %c0_i32 : i32, i32
  }
}

</mosaic_0001>

<bundles_post_ra>
// kernel: tpu_custom_call.1
= control target key start
LH: loop header
LB: loop body
LE: loop exit
PB: predicated region body
PF: predicated region fallthrough
CT: control target
= control target key end

     0   :  { %13 = vsyncpa [#allocation3], 0  ;;  %s738_s0 = inlined_call_operand.hbm [shape: f32[16,128], index: 0, kind: input, shape index: {}]   ;;  %s739_s1 = inlined_call_operand.hbm [shape: f32[16,128], index: 1, kind: input, shape index: {}]   ;;  %s740_s2 = inlined_call_operand.hbm [shape: bf16[128,128], index: 2, kind: input, shape index: {}]   ;;  %s741_s3 = inlined_call_operand.vmem [shape: f32[1,128], index: 3, kind: input, shape index: {}]   ;;  %s742_s4 = inlined_call_operand.hbm [shape: bf16[128,128], index: 4, kind: input, shape index: {}]   ;;  %s743_s5 = inlined_call_operand.vmem [shape: f32[1,128], index: 5, kind: input, shape index: {}]   ;;  %s744_s6 = inlined_call_operand.hbm [shape: f32[16,128], index: 6, kind: output, shape index: {0}]   ;;  %s745_s7 = inlined_call_operand.hbm [shape: f32[16,128], index: 7, kind: output, shape index: {1}]  }
   0x1   :  { %14 = vsyncpa [#allocation6], 0 }
   0x2   :  { %15 = vsyncpa [#allocation9], 0 }
   0x3   :  { %16 = vsyncpa [#allocation4], 0 }
   0x4   :  { %17 = vsyncpa [#allocation12], 0  ;;  %s35_s26 = sshll.u32 %s739_s1, 4  ;;  %s644_s27 = smov [#allocation5]   ;;  %s36_s26 = int_to_ptr.hbm [resolvable:$true] %s35_s26 }
   0x5   :  { %s37_s28 = sshll.u32 %s644_s27, 4  ;;  %s22_s8 = sshll.u32 %s738_s0, 4  ;;  %s38_s28 = int_to_ptr.vmem [resolvable:$true] %s37_s28  ;;  %s23_s8 = int_to_ptr.hbm [resolvable:$true] %s22_s8 }
   0x6   :  { %s645_s9 = smov 128   ;;  %s646_s10 = smov 8  }
   0x7   :  { %43 = dma.hbm_to_vmem [thread:$0]  %s36_s26, 256, %s38_s28, [#allocation6], %s645_s9, %s645_s9, %s646_s10  }
   0x8   :  { %s647_s11 = smov [#allocation2]   ;;  %s48_s1 = sshll.u32 %s740_s2, 4  ;;  %s49_s1 = int_to_ptr.hbm [resolvable:$true] %s48_s1 }
   0x9   :  { %s24_s12 = sshll.u32 %s647_s11, 4  ;;  %s648_s0 = smov [#allocation7]   ;;  %s25_s12 = int_to_ptr.vmem [resolvable:$true] %s24_s12 }
   0xa   :  { %30 = dma.hbm_to_vmem [thread:$0]  %s23_s8, 256, %s25_s12, [#allocation3], %s645_s9, %s645_s9, %s646_s10  }
   0xb   :  { %s50_s15 = sshll.u32 %s648_s0, 4  ;;  %s63_s18 = sshll.u32 %s742_s4, 4  ;;  %s51_s15 = int_to_ptr.vmem [resolvable:$true] %s50_s15  ;;  %s64_s18 = int_to_ptr.hbm [resolvable:$true] %s63_s18 }
   0xc   :  { %s649_s19 = smov 64   ;;  %s650_s20 = smov 4  }
   0xd   :  { %56 = dma.hbm_to_vmem [thread:$0]  %s49_s1, 1024, %s51_s15, [#allocation6], %s649_s19, %s649_s19, %s650_s20  }
   0xe   :  { %s651_s21 = smov [#allocation8]  }
   0xf   :  { %s65_s22 = sshll.u32 %s651_s21, 4  ;;  %s66_s22 = int_to_ptr.vmem [resolvable:$true] %s65_s22 }
  0x10   :  { %71 = dma.hbm_to_vmem [thread:$0]  %s64_s18, 1024, %s66_s22, [#allocation9], %s649_s19, %s649_s19, %s650_s20  }
  0x11   :  { %634 = dma.done.wait [#allocation3], 256  }
  0x12   :  { %635 = vsyncadd [#allocation3], 4294967040 }
  0x13   :  { %636 = dma.done.wait [#allocation6], 1280  }
  0x14   :  { %637 = vsyncadd [#allocation6], 4294966016 }
  0x15   :  { %638 = dma.done.wait [#allocation9], 1024  }
  0x16   :  { %639 = vsyncadd [#allocation9], 4294966272  ;;  %v449_v0 = vld [vmem:[#allocation7 + $0x38] sm:$0xff]  ;;  %v448_v1 = vld [vmem:[#allocation7 + $0x30] sm:$0xff]  ;;  %s358_s27 = sshll.u32 %s745_s7, 4  ;;  %s653_s7 = smov [#allocation10]   ;;  %s359_s27 = int_to_ptr.hbm [resolvable:$true] %s358_s27 }
  0x17   :  { %180 = vmatpush.bf16.msra.mxu0 %v449_v0  ;;  %273 = vmatpush.bf16.msra.mxu2 %v449_v0  ;;  %v457_v2 = vld [vmem:[#allocation8 + $0x38] sm:$0xff]  ;;  %v456_v3 = vld [vmem:[#allocation8 + $0x30] sm:$0xff]  ;;  %v447_v4 = vld [vmem:[#allocation7 + $0x28] sm:$0xff]  ;;  %s343_s28 = sshll.u32 %s653_s7, 4  ;;  %s345_s8 = sshll.u32 %s744_s6, 4  ;;  %s344_s28 = int_to_ptr.vmem [resolvable:$true] %s343_s28  ;;  %s346_s8 = int_to_ptr.hbm [resolvable:$true] %s345_s8 }
  0x18   :  { %252 = vmatpush.bf16.msra.mxu1 %v457_v2  ;;  %294 = vmatpush.bf16.msra.mxu3 %v457_v2  ;;  %v446_v5 = vld [vmem:[#allocation7 + $0x20] sm:$0xff]  ;;  %v445_v6 = vld [vmem:[#allocation7 + $0x18] sm:$0xff]  ;;  %v444_v7 = vld [vmem:[#allocation7 + $0x10] sm:$0xff] }
  0x19   :  { %v443_v8 = vld [vmem:[#allocation7 + $0x8] sm:$0xff]  ;;  %v442_v9 = vld [vmem:[#allocation7] sm:$0xff]  ;;  %v92_v10 = vld [vmem:[#allocation5] sm:$0xff] }
  0x1a   :  { %v93_v11 = vld [vmem:[#allocation5 + $0x8] sm:$0xff]  ;;  %v455_v13 = vld [vmem:[#allocation8 + $0x28] sm:$0xff]  ;;  %v454_v14 = vld [vmem:[#allocation8 + $0x20] sm:$0xff] }
  0x1b   :  { %181 = vmatpush.bf16.msra.mxu0 %v448_v1  ;;  %274 = vmatpush.bf16.msra.mxu2 %v448_v1  ;;  %v128_v12 = vpack.c.bf16 %v93_v11, %v92_v10  ;;  %v453_v15 = vld [vmem:[#allocation8 + $0x18] sm:$0xff]  ;;  %v452_v16 = vld [vmem:[#allocation8 + $0x10] sm:$0xff]  ;;  %v451_v17 = vld [vmem:[#allocation8 + $0x8] sm:$0xff] }
  0x1c   :  { %253 = vmatpush.bf16.msra.mxu1 %v456_v3  ;;  %295 = vmatpush.bf16.msra.mxu3 %v456_v3  ;;  %v450_v18 = vld [vmem:[#allocation8] sm:$0xff]  ;;  %v91_v28 = vld [vmem:[#allocation2 + $0x8] sm:$0xff] }
  0x1d   :  { %v715_v19 = vld [vmem:[%s741_s3] ss:$0 sm:$0xff] }
  0x1e   :  { %v90_v27 = vld [vmem:[#allocation2] sm:$0xff] }
  0x1f   :  { %182 = vmatpush.bf16.msra.mxu0 %v447_v4  ;;  %275 = vmatpush.bf16.msra.mxu2 %v447_v4  ;;  %v469_v33 = vld [vmem:[%s743_s5] ss:$0 sm:$0xff]  ;;  %s652_s5 = smov [#allocation11]  }
  0x20   :  { %254 = vmatpush.bf16.msra.mxu1 %v455_v13  ;;  %296 = vmatpush.bf16.msra.mxu3 %v455_v13  ;;  %s356_s24 = sshll.u32 %s652_s5, 4  ;;  %s357_s24 = int_to_ptr.vmem [resolvable:$true] %s356_s24 }
  0x23   :  { %183 = vmatpush.bf16.msra.mxu0 %v446_v5  ;;  %276 = vmatpush.bf16.msra.mxu2 %v446_v5 }
  0x24   :  { %255 = vmatpush.bf16.msra.mxu1 %v454_v14  ;;  %297 = vmatpush.bf16.msra.mxu3 %v454_v14 }
  0x27   :  { %184 = vmatpush.bf16.msra.mxu0 %v445_v6  ;;  %277 = vmatpush.bf16.msra.mxu2 %v445_v6 }
  0x28   :  { %256 = vmatpush.bf16.msra.mxu1 %v453_v15  ;;  %298 = vmatpush.bf16.msra.mxu3 %v453_v15 }
  0x2b   :  { %185 = vmatpush.bf16.msra.mxu0 %v444_v7  ;;  %278 = vmatpush.bf16.msra.mxu2 %v444_v7 }
  0x2c   :  { %257 = vmatpush.bf16.msra.mxu1 %v452_v16  ;;  %299 = vmatpush.bf16.msra.mxu3 %v452_v16 }
  0x2f   :  { %186 = vmatpush.bf16.msra.mxu0 %v443_v8  ;;  %279 = vmatpush.bf16.msra.mxu2 %v443_v8 }
  0x30   :  { %258 = vmatpush.bf16.msra.mxu1 %v451_v17  ;;  %300 = vmatpush.bf16.msra.mxu3 %v451_v17 }
  0x33   :  { %187 = vmatpush.bf16.msra.mxu0 %v442_v9  ;;  %280 = vmatpush.bf16.msra.mxu2 %v442_v9 }
  0x34   :  { %259 = vmatpush.bf16.msra.mxu1 %v450_v18  ;;  %301 = vmatpush.bf16.msra.mxu3 %v450_v18 }
  0x36   :  { %188 = vmatmul.bf16.vlgmr.msra.gmra.mxu0 %v128_v12 }
  0x37   :  { %315 = vmatpush.bf16.msrb.mxu0 %v449_v0 }
  0x3b   :  { %316 = vmatpush.bf16.msrb.mxu0 %v448_v1 }
  0x3f   :  { %317 = vmatpush.bf16.msrb.mxu0 %v447_v4 }
  0x43   :  { %318 = vmatpush.bf16.msrb.mxu0 %v446_v5 }
  0x47   :  { %319 = vmatpush.bf16.msrb.mxu0 %v445_v6 }
  0x4b   :  { %320 = vmatpush.bf16.msrb.mxu0 %v444_v7 }
  0x4f   :  { %321 = vmatpush.bf16.msrb.mxu0 %v443_v8 }
  0x53   :  { %322 = vmatpush.bf16.msrb.mxu0 %v442_v9 }
  0xb3   :  { %v189_v20 = vpop.f32.mrf.mxu0 }
  0xb4   :  { %v190_v21 = vadd.f32 %v715_v19, %v189_v20 }
  0xb6   :  { %470 = vtanh.f32 %v190_v21 }
  0xbb   :  { %v191_v22 = vpop.f32.mrf.mxu0 }
  0xbc   :  { %v192_v23 = vadd.f32 %v715_v19, %v191_v22  ;;  %v471_v24 = vpop.eup %470 }
  0xbd   :  { %v196_v25 = vadd.f32 1.0, %v471_v24 }
  0xbe   :  { %472 = vtanh.f32 %v192_v23 }
  0xbf   :  { %v198_v30 = vmul.f32 %v196_v25, %v90_v27 }
  0xc4   :  { %v473_v26 = vpop.eup %472 }
  0xc5   :  { %v197_v29 = vadd.f32 1.0, %v473_v26 }
  0xc7   :  { %v199_v31 = vmul.f32 %v197_v29, %v91_v28 }
  0xc9   :  { %v200_v32 = vpack.c.bf16 %v199_v31, %v198_v30 }
  0xcb   :  { %260 = vmatmul.bf16.vlgmr.msra.gmra.mxu1 %v200_v32 }
 0x148   :  { %v261_v34 = vpop.f32.mrf.mxu1 }
 0x149   :  { %v262_v35 = vadd.f32 %v469_v33, %v261_v34 }
 0x14b   :  { %474 = vtanh.f32 %v262_v35 }
 0x150   :  { %v263_v36 = vpop.f32.mrf.mxu1 }
 0x151   :  { %v264_v37 = vadd.f32 %v469_v33, %v263_v36  ;;  %v475_v38 = vpop.eup %474 }
 0x152   :  { %v268_v39 = vadd.f32 1.0, %v475_v38 }
 0x153   :  { %476 = vtanh.f32 %v264_v37 }
 0x154   :  { %v270_v42 = vmul.f32 %v268_v39, %v92_v10 }
 0x159   :  { %v477_v40 = vpop.eup %476 }
 0x15a   :  { %v269_v41 = vadd.f32 1.0, %v477_v40 }
 0x15c   :  { %v271_v43 = vmul.f32 %v269_v41, %v93_v11 }
 0x15e   :  { %v272_v44 = vpack.c.bf16 %v271_v43, %v270_v42 }
 0x160   :  { %281 = vmatmul.bf16.vlgmr.msra.gmra.mxu2 %v272_v44 }
 0x1e3   :  { %v282_v45 = vpop.f32.mrf.mxu2 }
 0x1e4   :  { %v283_v46 = vadd.f32 %v715_v19, %v282_v45 }
 0x1e6   :  { %478 = vtanh.f32 %v283_v46 }
 0x1eb   :  { %v284_v47 = vpop.f32.mrf.mxu2 }
 0x1ec   :  { %v285_v48 = vadd.f32 %v715_v19, %v284_v47  ;;  %v479_v49 = vpop.eup %478 }
 0x1ed   :  { %v289_v50 = vadd.f32 1.0, %v479_v49 }
 0x1ee   :  { %480 = vtanh.f32 %v285_v48 }
 0x1ef   :  { %v291_v53 = vmul.f32 %v289_v50, %v198_v30 }
 0x1f4   :  { %v481_v51 = vpop.eup %480 }
 0x1f5   :  { %v290_v52 = vadd.f32 1.0, %v481_v51 }
 0x1f7   :  { %v292_v54 = vmul.f32 %v290_v52, %v199_v31 }
 0x1f9   :  { %v293_v55 = vpack.c.bf16 %v292_v54, %v291_v53 }
 0x1fb   :  { %302 = vmatmul.bf16.vlgmr.msra.gmra.mxu3 %v293_v55 }
 0x27e   :  { %v303_v56 = vpop.f32.mrf.mxu3 }
 0x27f   :  { %v304_v57 = vadd.f32 %v469_v33, %v303_v56 }
 0x281   :  { %482 = vtanh.f32 %v304_v57 }
 0x286   :  { %v305_v58 = vpop.f32.mrf.mxu3 }
 0x287   :  { %v483_v59 = vpop.eup %482  ;;  %v306_v60 = vadd.f32 %v469_v33, %v305_v58 }
 0x288   :  { %v310_v61 = vadd.f32 1.0, %v483_v59 }
 0x289   :  { %484 = vtanh.f32 %v306_v60 }
 0x28a   :  { %v312_v62 = vmul.f32 %v310_v61, %v270_v42 }
 0x28c   :  { %337 = vst [vmem:[#allocation11] sm:$0xff] %v312_v62 }
 0x28f   :  { %v485_v63 = vpop.eup %484 }
 0x290   :  { %v311_v0 = vadd.f32 1.0, %v485_v63 }
 0x292   :  { %v313_v1 = vmul.f32 %v311_v0, %v271_v43 }
 0x294   :  { %338 = vst [vmem:[#allocation11 + $0x8] sm:$0xff] %v313_v1  ;;  %v314_v2 = vpack.c.bf16 %v313_v1, %v312_v62 }
 0x295   :  { %364 = dma.vmem_to_hbm [thread:$0]  %s357_s24, 256, %s359_s27, [#allocation12], %s645_s9, %s645_s9, %s646_s10  }
 0x296   :  { %323 = vmatmul.bf16.vlgmr.msrb.gmra.mxu0 %v314_v2 }
 0x313   :  { %v324_v3 = vpop.f32.mrf.mxu0 }
 0x314   :  { %v325_v4 = vadd.f32 %v715_v19, %v324_v3 }
 0x316   :  { %486 = vtanh.f32 %v325_v4 }
 0x31b   :  { %v326_v5 = vpop.f32.mrf.mxu0 }
 0x31c   :  { %v487_v6 = vpop.eup %486  ;;  %v327_v7 = vadd.f32 %v715_v19, %v326_v5 }
 0x31d   :  { %v331_v8 = vadd.f32 1.0, %v487_v6 }
 0x31e   :  { %488 = vtanh.f32 %v327_v7 }
 0x31f   :  { %v333_v9 = vmul.f32 %v331_v8, %v291_v53 }
 0x321   :  { %335 = vst [vmem:[#allocation10] sm:$0xff] %v333_v9 }
 0x324   :  { %v489_v10 = vpop.eup %488 }
 0x325   :  { %v332_v11 = vadd.f32 1.0, %v489_v10 }
 0x327   :  { %v334_v12 = vmul.f32 %v332_v11, %v292_v54 }
 0x329   :  { %336 = vst [vmem:[#allocation10 + $0x8] sm:$0xff] %v334_v12 }
 0x32a   :  { %351 = dma.vmem_to_hbm [thread:$0]  %s344_s28, 256, %s346_s8, [#allocation4], %s645_s9, %s645_s9, %s646_s10  }
 0x32b   :  { %640 = dma.done.wait [#allocation4], 256  }
 0x32c   :  { %641 = vsyncadd [#allocation4], 4294967040 }
 0x32d   :  { %642 = dma.done.wait [#allocation12], 256  }
 0x32e   :  { %643 = vsyncadd [#allocation12], 4294967040 }
 0x32f   :  { %373 = vsyncpa [#allocation3], 1 }
 0x330   :  { %374 = vsyncpa [#allocation6], 1 }
 0x331   :  { %375 = vsyncpa [#allocation9], 1 }
 0x332   :  { %376 = vsyncpa [#allocation4], 1 }
 0x333   :  { %377 = vsyncpa [#allocation12], 1 }

</bundles_post_ra>
